<compile_context>
chip_gen: v7x
topology: tpu7x:2x2x1
jax: 0.10.0
libtpu: 0.0.40
codegen_flags: <defaults>
</compile_context>

<pallas_src>
import jax
import jax.numpy as jnp
from jax.experimental import pallas as pl
from jax.experimental.pallas import tpu as pltpu

# ---- model hyper-parameters (from the module definition) -------------------
BIT_SIZE = 32
NUMBER_OF_VARIABLE = 4                   # csv-derived in torch; small synthetic choice
IN_DIM = NUMBER_OF_VARIABLE * BIT_SIZE   # 128
HIDDEN = 256
FEATURES = 16


def _cdiv(a, b):
    return -(-a // b)


def _round_up(n, m):
    return _cdiv(n, m) * m


def _choose_tiling(B, tb_max, min_grid_steps):
    """Pick (tb, B_pad) so padding is minimal and grid has >= min_grid_steps."""
    tiles = max(_cdiv(B, tb_max), 1)
    if B >= min_grid_steps * 8:          # only force multi-step when B allows it
        tiles = max(tiles, min_grid_steps)
    tb = _round_up(_cdiv(B, tiles), 8)   # sublane multiple of 8
    return tb, tiles * tb


def _vae_kernel(x_ref, eps_ref,
                w1_ref, b1_ref, w2_ref, b2_ref,
                wd1_ref, bd1_ref, wd2_ref, bd2_ref,
                recon_ref, mulv_ref):
    """One batch tile of the full VAE forward.

    x / weights are bf16 (MXU operands); biases, eps, accumulators and all
    elementwise math are f32 (works on v5e: no bf16 VPU/EUP there).
    """
    x = x_ref[...]                                                      # (TB, IN_DIM) bf16

    # encoder layer 1 + ReLU  (bf16 MXU, f32 accumulate)
    h1 = jnp.dot(x, w1_ref[...], preferred_element_type=jnp.float32) + b1_ref[...]
    h1 = jnp.maximum(h1, 0.0)                                           # (TB, 256) f32

    # encoder layer 2 -> packed [mu | log_var], single contiguous store
    enc = jnp.dot(h1.astype(jnp.bfloat16), w2_ref[...],
                  preferred_element_type=jnp.float32) + b2_ref[...]     # (TB, 2F) f32
    mulv_ref[...] = enc

    # reparameterize: z = mu + eps * exp(0.5 * log_var)
    # (offset-16 lane slice only feeds this tiny path; XLU has full slack here)
    mu = enc[:, :FEATURES]
    log_var = enc[:, FEATURES:]
    z = mu + eps_ref[...] * jnp.exp(0.5 * log_var)                      # (TB, F) f32

    # decoder layer 1 + ReLU
    h2 = jnp.dot(z.astype(jnp.bfloat16), wd1_ref[...],
                 preferred_element_type=jnp.float32) + bd1_ref[...]
    h2 = jnp.maximum(h2, 0.0)                                           # (TB, 256) f32

    # decoder layer 2 + sigmoid(x) = 1 / (1 + exp(-x)); exp on EUP, divide on
    # EUP vrcp via approx reciprocal (keeps the epilogue off the VALU).
    logits = jnp.dot(h2.astype(jnp.bfloat16), wd2_ref[...],
                     preferred_element_type=jnp.float32) + bd2_ref[...]
    recon = pl.reciprocal(1.0 + jnp.exp(-logits), approx=True)          # (TB, IN_DIM) f32
    recon_ref[...] = recon.astype(recon_ref.dtype)


def linear_vae_forward(x, params, eps, *, tb_max=1024, min_grid_steps=2,
                       recon_dtype=jnp.float32):
    """Full VAE forward: batch-tiled Pallas call with VMEM-resident weights."""
    w1, b1, w2, b2, wd1, bd1, wd2, bd2 = params
    B = x.shape[0]
    assert x.shape[1] == IN_DIM and eps.shape == (B, FEATURES)

    tb, B_pad = _choose_tiling(B, tb_max, min_grid_steps)
    if B_pad != B:
        x = jnp.pad(x, ((0, B_pad - B), (0, 0)))
        eps = jnp.pad(eps, ((0, B_pad - B), (0, 0)))

    # bf16 MXU operands; f32 accumulation happens inside the kernel.
    x_bf = x.astype(jnp.bfloat16)
    w1b, w2b, wd1b, wd2b = (w.astype(jnp.bfloat16) for w in (w1, w2, wd1, wd2))

    grid = (B_pad // tb,)

    def row_spec(n):                       # streamed per batch tile
        return pl.BlockSpec((tb, n), lambda i: (i, 0))

    def resident(a):                       # full array, constant block index -> stays in VMEM
        return pl.BlockSpec(a.shape, lambda i: (0, 0))

    recon_itemsize = jnp.dtype(recon_dtype).itemsize
    flops = 2 * B_pad * (IN_DIM * HIDDEN + HIDDEN * 2 * FEATURES
                         + FEATURES * HIDDEN + HIDDEN * IN_DIM)
    transcendentals = B_pad * (FEATURES + IN_DIM)                 # exp(std) + sigmoid exp
    bytes_accessed = (x_bf.size * 2 + eps.size * 4
                      + sum(w.size * 2 for w in (w1b, w2b, wd1b, wd2b))
                      + sum(b.size * 4 for b in (b1, b2, bd1, bd2))
                      + B_pad * IN_DIM * recon_itemsize
                      + B_pad * 2 * FEATURES * 4)

    recon, mulv = pl.pallas_call(
        _vae_kernel,
        grid=grid,
        in_specs=[
            row_spec(IN_DIM),              # x tile
            row_spec(FEATURES),            # eps tile
            resident(w1b), resident(b1),
            resident(w2b), resident(b2),
            resident(wd1b), resident(bd1),
            resident(wd2b), resident(bd2),
        ],
        out_specs=(row_spec(IN_DIM), row_spec(2 * FEATURES)),
        out_shape=(
            jax.ShapeDtypeStruct((B_pad, IN_DIM), recon_dtype),        # reconstruction
            jax.ShapeDtypeStruct((B_pad, 2 * FEATURES), jnp.float32),  # [mu | log_var]
        ),
        # NOTE(v7x): try pltpu.CORE_PARALLEL here and confirm the dual-TC split
        # in xprof; plain "parallel" is kept for portability to 1-core v5e/v6e.
        compiler_params=pltpu.CompilerParams(
            dimension_semantics=("parallel",)),
        cost_estimate=pl.CostEstimate(
            flops=flops, transcendentals=transcendentals,
            bytes_accessed=bytes_accessed),
    )(x_bf, eps, w1b, b1, w2b, b2, wd1b, bd1, wd2b, bd2)

    recon = recon[:B]
    mu = mulv[:B, :FEATURES]
    log_var = mulv[:B, FEATURES:]
    return recon, mu, log_var


def init_params(key):
    """PyTorch-Linear-style uniform +/-1/sqrt(fan_in) init.

    Weights stored transposed: (in_features, out_features). Biases as (1, out).
    """
    def linear(key, fan_in, fan_out):
        kw, kb = jax.random.split(key)
        bound = 1.0 / jnp.sqrt(fan_in)
        w = jax.random.uniform(kw, (fan_in, fan_out), jnp.float32, -bound, bound)
        b = jax.random.uniform(kb, (1, fan_out), jnp.float32, -bound, bound)
        return w, b

    k1, k2, k3, k4 = jax.random.split(key, 4)
    w1, b1 = linear(k1, IN_DIM, HIDDEN)        # enc1
    w2, b2 = linear(k2, HIDDEN, FEATURES * 2)  # enc2
    wd1, bd1 = linear(k3, FEATURES, HIDDEN)    # dec1
    wd2, bd2 = linear(k4, HIDDEN, IN_DIM)      # dec2
    return (w1, b1, w2, b2, wd1, bd1, wd2, bd2)


def reference_forward(x, params, eps):
    """Pure-JAX reference with the same bf16-MXU / f32-accumulate flow."""
    w1, b1, w2, b2, wd1, bd1, wd2, bd2 = params
    bf, f32 = jnp.bfloat16, jnp.float32
    h1 = jax.nn.relu(jnp.dot(x.astype(bf), w1.astype(bf),
                             preferred_element_type=f32) + b1)
    enc = jnp.dot(h1.astype(bf), w2.astype(bf), preferred_element_type=f32) + b2
    mu, log_var = enc[:, :FEATURES], enc[:, FEATURES:]
    z = mu + eps * jnp.exp(0.5 * log_var)
    h2 = jax.nn.relu(jnp.dot(z.astype(bf), wd1.astype(bf),
                             preferred_element_type=f32) + bd1)
    recon = jax.nn.sigmoid(jnp.dot(h2.astype(bf), wd2.astype(bf),
                                   preferred_element_type=f32) + bd2)
    return recon, mu, log_var


if __name__ == "__main__":
    key = jax.random.PRNGKey(0)
    k_params, k_x, k_eps = jax.random.split(key, 3)

    # TODO(synk): torch.randn_like(std) is drawn host-side (deterministic eps
    # input); in-kernel pltpu.prng_* would remove the eps DMA stream but breaks
    # bitwise reproducibility against the pure-JAX reference.
    B = 100                       # -> 2 grid steps of 56 rows, 12 padded rows
    params = init_params(k_params)
    x = jax.random.uniform(k_x, (B, IN_DIM), jnp.float32)      # bit-vector-like input
    eps = jax.random.normal(k_eps, (B, FEATURES), jnp.float32)

    recon, mu, log_var = linear_vae_forward(x, params, eps)
    jax.block_until_ready((recon, mu, log_var))

    # sanity check against pure-JAX reference (same bf16 matmul path)
    r_ref, mu_ref, lv_ref = reference_forward(x, params, eps)
    assert recon.shape == (B, IN_DIM) and mu.shape == (B, FEATURES)
    assert log_var.shape == (B, FEATURES)
    assert jnp.allclose(recon, r_ref, atol=1e-2), "reconstruction mismatch"
    assert jnp.allclose(mu, mu_ref, atol=1e-2), "mu mismatch"
    assert jnp.allclose(log_var, lv_ref, atol=1e-2), "log_var mismatch"

    print("KERNEL_OK")
</pallas_src>

<mosaic_0001>
module attributes {stable_mosaic.version = 11 : i64} {
  func.func @_vae_kernel(%arg0: i32, %arg1: memref<56x128xbf16, #tpu.memory_space<vmem>>, %arg2: memref<56x16xf32, #tpu.memory_space<vmem>>, %arg3: memref<128x256xbf16, #tpu.memory_space<vmem>>, %arg4: memref<1x256xf32, #tpu.memory_space<vmem>>, %arg5: memref<256x32xbf16, #tpu.memory_space<vmem>>, %arg6: memref<1x32xf32, #tpu.memory_space<vmem>>, %arg7: memref<16x256xbf16, #tpu.memory_space<vmem>>, %arg8: memref<1x256xf32, #tpu.memory_space<vmem>>, %arg9: memref<256x128xbf16, #tpu.memory_space<vmem>>, %arg10: memref<1x128xf32, #tpu.memory_space<vmem>>, %arg11: memref<56x128xf32, #tpu.memory_space<vmem>>, %arg12: memref<56x32xf32, #tpu.memory_space<vmem>>) attributes {dimension_semantics = [#tpu.dimension_semantics<parallel>], iteration_bounds = array<i64: 2>, scalar_prefetch = 0 : i64, scratch_operands = 0 : i64, tpu.core_type = #tpu.core_type<tc>, window_params = [{transform_indices = @transform_0, window_bounds = array<i64: 56, 128>}, {transform_indices = @transform_1, window_bounds = array<i64: 56, 16>}, {pipeline_mode = #tpu.pipeline_mode<synchronous>, transform_indices = @transform_2, window_bounds = array<i64: 128, 256>}, {pipeline_mode = #tpu.pipeline_mode<synchronous>, transform_indices = @transform_3, window_bounds = array<i64: 1, 256>}, {pipeline_mode = #tpu.pipeline_mode<synchronous>, transform_indices = @transform_4, window_bounds = array<i64: 256, 32>}, {pipeline_mode = #tpu.pipeline_mode<synchronous>, transform_indices = @transform_5, window_bounds = array<i64: 1, 32>}, {pipeline_mode = #tpu.pipeline_mode<synchronous>, transform_indices = @transform_6, window_bounds = array<i64: 16, 256>}, {pipeline_mode = #tpu.pipeline_mode<synchronous>, transform_indices = @transform_7, window_bounds = array<i64: 1, 256>}, {pipeline_mode = #tpu.pipeline_mode<synchronous>, transform_indices = @transform_8, window_bounds = array<i64: 256, 128>}, {pipeline_mode = #tpu.pipeline_mode<synchronous>, transform_indices = @transform_9, window_bounds = array<i64: 1, 128>}, {transform_indices = @transform_10, window_bounds = array<i64: 56, 128>}, {transform_indices = @transform_11, window_bounds = array<i64: 56, 32>}]} {
    %c0 = arith.constant 0 : index
    %c0_0 = arith.constant 0 : index
    %0 = vector.load %arg1[%c0, %c0_0] : memref<56x128xbf16, #tpu.memory_space<vmem>>, vector<56x128xbf16>
    %c0_1 = arith.constant 0 : index
    %c0_2 = arith.constant 0 : index
    %1 = vector.load %arg3[%c0_1, %c0_2] : memref<128x256xbf16, #tpu.memory_space<vmem>>, vector<128x256xbf16>
    %cst = arith.constant dense<0.000000e+00> : vector<56x256xf32>
    %2 = tpu.matmul %0, %1, %cst {dimension_numbers = #tpu.dot_dimension_numbers<[1], [0], [0], [1], [0, 0, 1, 1], [], []>} : vector<56x128xbf16>, vector<128x256xbf16>, vector<56x256xf32> -> vector<56x256xf32>
    %c0_3 = arith.constant 0 : index
    %c0_4 = arith.constant 0 : index
    %3 = vector.load %arg4[%c0_3, %c0_4] : memref<1x256xf32, #tpu.memory_space<vmem>>, vector<1x256xf32>
    %4 = vector.broadcast %3 : vector<1x256xf32> to vector<56x256xf32>
    %5 = arith.addf %2, %4 : vector<56x256xf32>
    %cst_5 = arith.constant 0.000000e+00 : f32
    %6 = vector.broadcast %cst_5 : f32 to vector<56x256xf32>
    %7 = arith.maximumf %5, %6 : vector<56x256xf32>
    %8 = arith.truncf %7 : vector<56x256xf32> to vector<56x256xbf16>
    %c0_6 = arith.constant 0 : index
    %c0_7 = arith.constant 0 : index
    %9 = vector.load %arg5[%c0_6, %c0_7] : memref<256x32xbf16, #tpu.memory_space<vmem>>, vector<256x32xbf16>
    %cst_8 = arith.constant dense<0.000000e+00> : vector<56x32xf32>
    %10 = tpu.matmul %8, %9, %cst_8 {dimension_numbers = #tpu.dot_dimension_numbers<[1], [0], [0], [1], [0, 0, 1, 1], [], []>} : vector<56x256xbf16>, vector<256x32xbf16>, vector<56x32xf32> -> vector<56x32xf32>
    %c0_9 = arith.constant 0 : index
    %c0_10 = arith.constant 0 : index
    %11 = vector.load %arg6[%c0_9, %c0_10] : memref<1x32xf32, #tpu.memory_space<vmem>>, vector<1x32xf32>
    %12 = vector.broadcast %11 : vector<1x32xf32> to vector<56x32xf32>
    %13 = arith.addf %10, %12 : vector<56x32xf32>
    %c0_11 = arith.constant 0 : index
    %c0_12 = arith.constant 0 : index
    %14 = vector.load %arg12[%c0_11, %c0_12] : memref<56x32xf32, #tpu.memory_space<vmem>>, vector<56x32xf32>
    tpu.vector_store %arg12[%c0_11, %c0_12], %13 {strides = array<i32>} : memref<56x32xf32, #tpu.memory_space<vmem>>, vector<56x32xf32>,
    %15 = vector.extract_strided_slice %13 {offsets = [0, 0], sizes = [56, 16], strides = [1, 1]} : vector<56x32xf32> to vector<56x16xf32>
    %16 = vector.extract_strided_slice %13 {offsets = [0, 16], sizes = [56, 16], strides = [1, 1]} : vector<56x32xf32> to vector<56x16xf32>
    %c0_13 = arith.constant 0 : index
    %c0_14 = arith.constant 0 : index
    %17 = vector.load %arg2[%c0_13, %c0_14] : memref<56x16xf32, #tpu.memory_space<vmem>>, vector<56x16xf32>
    %cst_15 = arith.constant 5.000000e-01 : f32
    %18 = vector.broadcast %cst_15 : f32 to vector<56x16xf32>
    %19 = arith.mulf %18, %16 : vector<56x16xf32>
    %20 = math.exp %19 : vector<56x16xf32>
    %21 = arith.mulf %17, %20 : vector<56x16xf32>
    %22 = arith.addf %15, %21 : vector<56x16xf32>
    %23 = arith.truncf %22 : vector<56x16xf32> to vector<56x16xbf16>
    %c0_16 = arith.constant 0 : index
    %c0_17 = arith.constant 0 : index
    %24 = vector.load %arg7[%c0_16, %c0_17] : memref<16x256xbf16, #tpu.memory_space<vmem>>, vector<16x256xbf16>
    %cst_18 = arith.constant dense<0.000000e+00> : vector<56x256xf32>
    %25 = tpu.matmul %23, %24, %cst_18 {dimension_numbers = #tpu.dot_dimension_numbers<[1], [0], [0], [1], [0, 0, 1, 1], [], []>} : vector<56x16xbf16>, vector<16x256xbf16>, vector<56x256xf32> -> vector<56x256xf32>
    %c0_19 = arith.constant 0 : index
    %c0_20 = arith.constant 0 : index
    %26 = vector.load %arg8[%c0_19, %c0_20] : memref<1x256xf32, #tpu.memory_space<vmem>>, vector<1x256xf32>
    %27 = vector.broadcast %26 : vector<1x256xf32> to vector<56x256xf32>
    %28 = arith.addf %25, %27 : vector<56x256xf32>
    %cst_21 = arith.constant 0.000000e+00 : f32
    %29 = vector.broadcast %cst_21 : f32 to vector<56x256xf32>
    %30 = arith.maximumf %28, %29 : vector<56x256xf32>
    %31 = arith.truncf %30 : vector<56x256xf32> to vector<56x256xbf16>
    %c0_22 = arith.constant 0 : index
    %c0_23 = arith.constant 0 : index
    %32 = vector.load %arg9[%c0_22, %c0_23] : memref<256x128xbf16, #tpu.memory_space<vmem>>, vector<256x128xbf16>
    %cst_24 = arith.constant dense<0.000000e+00> : vector<56x128xf32>
    %33 = tpu.matmul %31, %32, %cst_24 {dimension_numbers = #tpu.dot_dimension_numbers<[1], [0], [0], [1], [0, 0, 1, 1], [], []>} : vector<56x256xbf16>, vector<256x128xbf16>, vector<56x128xf32> -> vector<56x128xf32>
    %c0_25 = arith.constant 0 : index
    %c0_26 = arith.constant 0 : index
    %34 = vector.load %arg10[%c0_25, %c0_26] : memref<1x128xf32, #tpu.memory_space<vmem>>, vector<1x128xf32>
    %35 = vector.broadcast %34 : vector<1x128xf32> to vector<56x128xf32>
    %36 = arith.addf %33, %35 : vector<56x128xf32>
    %cst_27 = arith.constant 0.000000e+00 : f32
    %37 = vector.broadcast %cst_27 : f32 to vector<56x128xf32>
    %38 = arith.subf %37, %36 : vector<56x128xf32>
    %39 = math.exp %38 : vector<56x128xf32>
    %cst_28 = arith.constant 1.000000e+00 : f32
    %40 = vector.broadcast %cst_28 : f32 to vector<56x128xf32>
    %41 = arith.addf %40, %39 : vector<56x128xf32>
    %42 = tpu.reciprocal %41 {approx = true} : vector<56x128xf32> -> vector<56x128xf32>
    %c0_29 = arith.constant 0 : index
    %c0_30 = arith.constant 0 : index
    %43 = vector.load %arg11[%c0_29, %c0_30] : memref<56x128xf32, #tpu.memory_space<vmem>>, vector<56x128xf32>
    tpu.vector_store %arg11[%c0_29, %c0_30], %42 {strides = array<i32>} : memref<56x128xf32, #tpu.memory_space<vmem>>, vector<56x128xf32>,
    return
  }
  func.func @transform_0(%arg0: i32) -> (i32, i32) {
    %c0_i32 = arith.constant 0 : i32
    %c0_i32_0 = arith.constant 0 : i32
    return %arg0, %c0_i32 : i32, i32
  }
  func.func @transform_1(%arg0: i32) -> (i32, i32) {
    %c0_i32 = arith.constant 0 : i32
    %c0_i32_0 = arith.constant 0 : i32
    return %arg0, %c0_i32 : i32, i32
  }
  func.func @transform_2(%arg0: i32) -> (i32, i32) {
    %c0_i32 = arith.constant 0 : i32
    %c0_i32_0 = arith.constant 0 : i32
    %c0_i32_1 = arith.constant 0 : i32
    return %c0_i32, %c0_i32_0 : i32, i32
  }
  func.func @transform_3(%arg0: i32) -> (i32, i32) {
    %c0_i32 = arith.constant 0 : i32
    %c0_i32_0 = arith.constant 0 : i32
    %c0_i32_1 = arith.constant 0 : i32
    return %c0_i32, %c0_i32_0 : i32, i32
  }
  func.func @transform_4(%arg0: i32) -> (i32, i32) {
    %c0_i32 = arith.constant 0 : i32
    %c0_i32_0 = arith.constant 0 : i32
    %c0_i32_1 = arith.constant 0 : i32
    return %c0_i32, %c0_i32_0 : i32, i32
  }
  func.func @transform_5(%arg0: i32) -> (i32, i32) {
    %c0_i32 = arith.constant 0 : i32
    %c0_i32_0 = arith.constant 0 : i32
    %c0_i32_1 = arith.constant 0 : i32
    return %c0_i32, %c0_i32_0 : i32, i32
  }
  func.func @transform_6(%arg0: i32) -> (i32, i32) {
    %c0_i32 = arith.constant 0 : i32
    %c0_i32_0 = arith.constant 0 : i32
    %c0_i32_1 = arith.constant 0 : i32
    return %c0_i32, %c0_i32_0 : i32, i32
  }
  func.func @transform_7(%arg0: i32) -> (i32, i32) {
    %c0_i32 = arith.constant 0 : i32
    %c0_i32_0 = arith.constant 0 : i32
    %c0_i32_1 = arith.constant 0 : i32
    return %c0_i32, %c0_i32_0 : i32, i32
  }
  func.func @transform_8(%arg0: i32) -> (i32, i32) {
    %c0_i32 = arith.constant 0 : i32
    %c0_i32_0 = arith.constant 0 : i32
    %c0_i32_1 = arith.constant 0 : i32
    return %c0_i32, %c0_i32_0 : i32, i32
  }
  func.func @transform_9(%arg0: i32) -> (i32, i32) {
    %c0_i32 = arith.constant 0 : i32
    %c0_i32_0 = arith.constant 0 : i32
    %c0_i32_1 = arith.constant 0 : i32
    return %c0_i32, %c0_i32_0 : i32, i32
  }
  func.func @transform_10(%arg0: i32) -> (i32, i32) {
    %c0_i32 = arith.constant 0 : i32
    %c0_i32_0 = arith.constant 0 : i32
    return %arg0, %c0_i32 : i32, i32
  }
  func.func @transform_11(%arg0: i32) -> (i32, i32) {
    %c0_i32 = arith.constant 0 : i32
    %c0_i32_0 = arith.constant 0 : i32
    return %arg0, %c0_i32 : i32, i32
  }
}

</mosaic_0001>

<bundles_post_ra>
// kernel: tpu_custom_call.1
= control target key start
LH: loop header
LB: loop body
LE: loop exit
PB: predicated region body
PF: predicated region fallthrough
CT: control target
= control target key end

     0   :  { %s2475_s0 = inlined_call_operand.hbm [shape: bf16[112,128], index: 0, kind: input, shape index: {}]   ;;  %s2476_s1 = inlined_call_operand.vmem [shape: f32[112,16], index: 1, kind: input, shape index: {}]   ;;  %s2477_s2 = inlined_call_operand.vmem [shape: bf16[128,256], index: 2, kind: input, shape index: {}]   ;;  %s2478_s3 = inlined_call_operand.vmem [shape: f32[1,256], index: 3, kind: input, shape index: {}]   ;;  %s2479_s4 = inlined_call_operand.vmem [shape: bf16[256,32], index: 4, kind: input, shape index: {}]   ;;  %s2480_s5 = inlined_call_operand.hbm [shape: f32[1,32], index: 5, kind: input, shape index: {}]   ;;  %s2481_s6 = inlined_call_operand.vmem [shape: bf16[16,256], index: 6, kind: input, shape index: {}]   ;;  %s2482_s7 = inlined_call_operand.vmem [shape: f32[1,256], index: 7, kind: input, shape index: {}]   ;;  %s2483_s8 = inlined_call_operand.vmem [shape: bf16[256,128], index: 8, kind: input, shape index: {}]   ;;  %s2484_s9 = inlined_call_operand.vmem [shape: f32[1,128], index: 9, kind: input, shape index: {}]   ;;  %s2485_s10 = inlined_call_operand.hbm [shape: f32[112,128], index: 10, kind: output, shape index: {0}]   ;;  %s2486_s11 = inlined_call_operand.vmem [shape: f32[112,32], index: 11, kind: output, shape index: {1}]  }
   0x1   :  { %2498 = sst [smem:[#allocation16_spill]] %s2485_s10 }
   0x2   :  { %17 = vsyncpa [#allocation3], 0 }
   0x3   :  { %19 = vsyncpa [#allocation3 + $0x1], 0 }
   0x4   :  { %20 = vsyncpa [#allocation6], 0 }
   0x5   :  { %21 = vsyncpa [#allocation4], 0 }
   0x6   :  { %23 = vsyncpa [#allocation4 + $0x1], 0  ;;  %s2006_s17 = smov 0   ;;  %s2008_s18 = smov 0  }
   0x7   :  { %s2010_s19 = smov 0   ;;  %s2012_s20 = smov 0  }
   0x8 LB: > { %2499 = sst [smem:[#allocation11_spill]] %s1923_s17  ;;  %s2027_s21 = sadd.s32 4294967295, %s1935_s20   ;;  %s1935_s20 = sphi %s2012_s20, %s2523_s20   ;;  %s1931_s19 = sphi %s2010_s19, %s2525_s19   ;;  %s1927_s18 = sphi %s2008_s18, %s2527_s18   ;;  %s1923_s17 = sphi %s2006_s17, %s2526_s17  }
   0x9   : > { %2500 = sst [smem:[#allocation12_spill]] %s1931_s19  ;;  %s1482_s22 = sadd.s32 4294967294, %s1935_s20  }
   0xa   : > { %s2031_s23 = sadd.s32 1, %s1935_s20   ;;  %s36_s24 = sadd.s32 1, %s1931_s19 }
   0xb   : > { %2501 = sst [smem:[#allocation13_spill]] %s2031_s23  ;;  %s33_s25 = ssub.s32 %s1935_s20, %s2031_s23 }
   0xc   : > { %p43_p0 = scmp.ne.s32.totalorder %s1931_s19, %s1927_s18  ;;  %p34_p1 = scmp.eq.s32.totalorder %s33_s25, 0 }
   0xd   : > { %p44_p2 = scmp.eq.s32.totalorder %s1935_s20, 0  ;;  %p49_p3 = scmp.ne.s32.totalorder %s1927_s18, %s1923_s17 }
   0xe   : > { %p2487_p4 = scmp.eq.s32.totalorder %s2027_s21, 0  ;;  %p267_p7 = scmp.eq.s32.totalorder %s2027_s21, 1 }
   0xf   : > { %s2043_s26 = scalar_select %p34_p1, %s1931_s19, %s36_s24  }
  0x10   : > { %p2045_p5 = por %p44_p2, %p43_p0  ;;  %p2051_p6 = por %p2487_p4, %p49_p3 }
  0x11   : > { %2502 = sst [smem:[#allocation14_spill]] %s2043_s26  ;;  %p273_p8 = scmp.eq.s32.totalorder %s1482_s22, 1 }
  0x12   : > { %s2504_s28 = scalar_select %p2051_p6, 1, 0 }
  0x13   : > { %p1483_p9 = scmp.ge.s32.totalorder %s1935_s20, 1  ;;  %p306_p10 = scmp.lt.s32.totalorder %s1935_s20, 3 }
  0x14   : > { %p2058_p11 = por %p267_p7, %p43_p0  ;;  %p2062_p12 = por %p273_p8, %p49_p3 }
  0x15   : > { %p2066_p13 = pnand %p1483_p9, %p306_p10  ;;  %s1937_s13 = smov [#allocation5]  }
  0x16   : > { %s2505_s29 = scalar_select %p2058_p11, 1, 0 }
  0x17   : > { %s2506_s30 = scalar_select %p2062_p12, 1, 0 }
  0x18   : > { %s2508_s12 = scalar_select %p2066_p13, 1, 0 }
  0x19   : > { %2507 = sst [smem:[#allocation15_spill]] %s2506_s30  ;;  %p1647_p2 = pneg %p2066_p13 }
  0x1a   : > { %s328_s14 = sshll.u32 %s1937_s13, 4  ;;  %p1660_p4 = scmp.lt.s32.totalorder %s1935_s20, 2  ;;  %s329_s14 = int_to_ptr.vmem [resolvable:$true] %s328_s14 }
  0x1b   : > { %p2509_p0 = scmp.eq.s32.totalorder %s2027_s21, 0  ;;  %s351_s16 = sand.u32 1, %s1931_s19  }
  0x1c   : > { %p2083_p3 = pnand %p1660_p4, %p2045_p5  ;;  %s1636_s24 = smul.u32 28, %s351_s16 }
  0x1d   : > { %p2076_p7 = pnand %p1647_p2, %p2509_p0  ;;  %s1807_s23 = scalar_lea.hbm %s2480_s5, 16 }
  0x1e   : > { %s2511_s22 = scalar_select %p2083_p3, 1, 0 }
  0x1f   : > { %p1808_p8 = scmp.ne.s32.totalorder %s2480_s5, %s1807_s23  ;;  %p1809_p9 = pneg %p2076_p7 }
  0x20   : > { %p1814_p4 = scmp.lt.u32.totalorder %s1807_s23, %s2480_s5 }
  0x21   : > { %p1810_p10 = pnand %p1809_p9, %p1808_p8 }
  0x23   : > { %p1811_p2 = pneg %p1810_p10 }
  0x25   : > { %p1816_p5 = pnand %p1814_p4, %p1811_p2 }
  0x27   : > { %1819 = shalt.err (!%p1816_p5)
}
  0x28   : > { %s1820_s27 = scalar_lea.vmem %s329_s14, 16  ;;  %s1827_s26 = scalar_lea.vmem %s329_s14, 32 }
  0x29   : > { %p1821_p0 = scmp.ne.s32.totalorder %s329_s14, %s1820_s27  ;;  %p1828_p11 = scmp.lt.s32.totalorder %s329_s14, %s329_s14 }
  0x2a   : > { %p1829_p6 = scmp.lt.s32.totalorder %s1827_s26, %s1820_s27 }
  0x2b   : > { %p1823_p1 = pnand %p1821_p0, %p1809_p9 }
  0x2c   : > { %p1830_p13 = por %p1829_p6, %p1828_p11 }
  0x2d   : > { %p1824_p12 = pneg %p1823_p1 }
  0x2f   : > { %p1831_p3 = pnand %p1830_p13, %p1824_p12 }
  0x31   : > { %1834 = shalt.err (!%p1831_p3)
}
  0x32   : > { %1650 = dma.hbm_to_vmem [thread:$0]  (!%p2076_p7), %s2480_s5, 16, %s329_s14, [#allocation6]  }
  0x33   : > { %s1554_s17 = smul.u32 448, %s1935_s20  ;;  %s355_s19 = scalar_lea.vmem [#allocation2], %s1636_s24 }
  0x34   : > { %s362_s23 = sshll.u32 %s355_s19, 4  ;;  %s2111_s15 = scalar_lea.sflag [#allocation3], %s351_s16  ;;  %s2104_s23 = int_to_ptr.vmem [resolvable:$true] %s362_s23 }
  0x35   : > { %s2109_s27 = scalar_lea.hbm %s2475_s0, %s1554_s17  ;;  %p2512_p11 = scmp.ne.s32.totalorder %s2511_s22, 0 }
  0x36   : > { %s1835_s26 = scalar_lea.hbm %s2109_s27, 448  ;;  %s1840_s10 = scalar_lea.hbm %s2475_s0, 896 }
  0x37   : > { %p1836_p6 = scmp.ne.s32.totalorder %s2109_s27, %s1835_s26  ;;  %p1837_p12 = pneg %p2512_p11 }
  0x38   : > { %p1841_p7 = scmp.lt.u32.totalorder %s2109_s27, %s2475_s0  ;;  %p1842_p3 = scmp.lt.u32.totalorder %s1840_s10, %s1835_s26 }
  0x39   : > { %p1838_p13 = pnand %p1837_p12, %p1836_p6  ;;  %p1844_p9 = scmp.lt.u32.totalorder %s1835_s26, %s2109_s27 }
  0x3a   : > { %p1843_p8 = por %p1842_p3, %p1841_p7 }
  0x3b   : > { %p1839_p1 = pneg %p1838_p13 }
  0x3c   : > { %p1845_p10 = por %p1844_p9, %p1843_p8 }
  0x3e   : > { %p1846_p2 = pnand %p1845_p10, %p1839_p1 }
  0x40   : > { %1849 = shalt.err (!%p1846_p2)
}
  0x41   : > { %s1850_s16 = scalar_lea.vmem %s2104_s23, 448  ;;  %s1938_s17 = smov [#allocation2]  }
  0x42   : > { %p1851_p4 = scmp.ne.s32.totalorder %s2104_s23, %s1850_s16  ;;  %s1855_s19 = sshll.u32 %s1938_s17, 4  ;;  %s1856_s19 = int_to_ptr.vmem [resolvable:$false] %s1855_s19 }
  0x43   : > { %s1857_s13 = scalar_lea.vmem %s1856_s19, 896  ;;  %p1858_p6 = scmp.lt.s32.totalorder %s2104_s23, %s1856_s19 }
  0x44   : > { %p1853_p5 = pnand %p1851_p4, %p1837_p12  ;;  %p1859_p13 = scmp.lt.s32.totalorder %s1857_s13, %s1850_s16 }
  0x46   : > { %p1854_p0 = pneg %p1853_p5  ;;  %p1860_p7 = por %p1859_p13, %p1858_p6 }
  0x48   : > { %p1861_p3 = pnand %p1860_p7, %p1854_p0 }
  0x4a   : > { %1864 = shalt.err (!%p1861_p3)
}
  0x4b   : > { %s1939_s26 = smov 64   ;;  %s1940_s14 = smov 4  }
  0x4c   : > { %1654 = dma.hbm_to_vmem [thread:$0]  (!%p2512_p11), %s2109_s27, 448, %s2104_s23, %s2111_s15, %s1939_s26, %s1939_s26, %s1940_s14  }
  0x4d   : > { %p2513_p12 = scmp.ne.s32.totalorder %s2508_s12, 0 }
  0x4e   : > { %s2142_s24 = sand.u32 (!%p2513_p12), 1, %s1927_s18   ;;  %p2514_p1 = scmp.ne.s32.totalorder (!%p2513_p12), %s2504_s28, 0 }
  0x4f   : > { %383 = sbr.rel (%p2513_p12) target bundleno = 1208 (0x4b8), region = 60  ;;  %s386_s30 = scalar_lea.sflag (!%p2513_p12), [#allocation3], %s2142_s24 }
  0x50   : > { %s1637_s10 = smul.u32 (!%p2513_p12), 28, %s2142_s24 }
  0x52   : > { %s2146_s25 = scalar_lea.vmem (!%p2513_p12), [#allocation2], %s1637_s10 }
  0x56   : > { %1910 = dma.done.wait (%p2514_p1), %s386_s30, 448  }
  0x57   : > { %1912 = vsyncadd (%p2514_p1), %s386_s30, 4294966848  ;;  %p2515_p11 = scmp.eq.s32.totalorder %s2027_s21, 0 }
  0x59   : > { %1914 = dma.done.wait (%p2515_p11), [#allocation6], 16   ;;  %p2516_p8 = pmov %p2515_p11 }
  0x5a   : > { %v1941_v0 = vmov 0   ;;  %v1702_v1 = vld [vmem:[%s2477_s2 + $0x4] ss:$8 sps:$4 sm:$0xff]   ;;  %v1704_v2 = vld [vmem:[%s2477_s2] ss:$8 sps:$4 sm:$0xff]   ;;  %v1734_v17 = vld [vmem:[%s2479_s4 + $0x50] sm:$0xff]   ;;  %v482_v37 = vlaneseq }
  0x5b   : > { %1916 = vsyncadd (%p2516_p8), [#allocation6], 4294967280  ;;  %626 = vmatprep.mubr.bf16.mxu0 %v1941_v0  ;;  %594 = vmatprep.subr.bf16.mxu0 %v1702_v1  ;;  %v1705_v3 = vld [vmem:[%s2477_s2 + $0x14] ss:$8 sps:$4 sm:$0xff]   ;;  %v1707_v4 = vld [vmem:[%s2477_s2 + $0x10] ss:$8 sps:$4 sm:$0xff]  }
  0x5c   : > { %595 = vmatpush1.bf16.msra.mxu0 %v1704_v2  ;;  %v1708_v5 = vld [vmem:[%s2477_s2 + $0x24] ss:$8 sps:$4 sm:$0xff]   ;;  %v1710_v6 = vld [vmem:[%s2477_s2 + $0x20] ss:$8 sps:$4 sm:$0xff]   ;;  %v1711_v7 = vld [vmem:[%s2477_s2 + $0x34] ss:$8 sps:$4 sm:$0xff]  }
  0x5d   : > { %596 = vmatprep.subr.bf16.mxu0 %v1705_v3  ;;  %v1713_v8 = vld [vmem:[%s2477_s2 + $0x30] ss:$8 sps:$4 sm:$0xff]   ;;  %v1714_v9 = vld [vmem:[%s2477_s2 + $0x44] ss:$8 sps:$4 sm:$0xff]   ;;  %v1716_v10 = vld [vmem:[%s2477_s2 + $0x40] ss:$8 sps:$4 sm:$0xff]  }
  0x5e   : > { %v1717_v11 = vld [vmem:[%s2477_s2 + $0x54] ss:$8 sps:$4 sm:$0xff]   ;;  %v1730_v12 = vld [vmem:[%s2479_s4 + $0x40] sm:$0xff]   ;;  %v1719_v14 = vld [vmem:[%s2477_s2 + $0x50] ss:$8 sps:$4 sm:$0xff]   ;;  %v2261_v38 = vshrl.u32 %v482_v37, 7 }
  0x5f   : > { %v1731_v13 = vld [vmem:[%s2479_s4] sm:$0xff]   ;;  %1556 = vmatprep.subr.bf16.mxu1 %v1730_v12  ;;  %v1732_v15 = vld [vmem:[%s2479_s4 + $0x48] sm:$0xff]   ;;  %v1735_v20 = vld [vmem:[%s2479_s4 + $0x10] sm:$0xff]   ;;  %s443_s30 = smul.u32 7, %s2027_s21  ;;  %vm886_vm0 = vcmask 261120   ;;  %s1942_s28 = smov 112  }
  0x60   : > { %597 = vmatpush1.bf16.msra.mxu0 %v1707_v4  ;;  %1557 = vmatpush3.bf16.msra.mxu1 %v1731_v13  ;;  %v1733_v16 = vld [vmem:[%s2479_s4 + $0x8] sm:$0xff]   ;;  %v1736_v21 = vld [vmem:[%s2479_s4 + $0x58] sm:$0xff]   ;;  %v1738_v25 = vld [vmem:[%s2479_s4 + $0x60] sm:$0xff]   ;;  %v484_v39 = vsub.s32 0, %v2261_v38  ;;  %v488_v41 = vsub.s32 1, %v2261_v38  ;;  %vm992_vm1 = vcmask 130048  }
  0x61   : > { %598 = vmatprep.subr.bf16.mxu0 %v1708_v5  ;;  %1558 = vmatprep.subr.bf16.mxu1 %v1732_v15  ;;  %v1720_v18 = vld [vmem:[%s2477_s2 + $0x64] ss:$8 sps:$4 sm:$0xff]   ;;  %v1722_v19 = vld [vmem:[%s2477_s2 + $0x60] ss:$8 sps:$4 sm:$0xff]   ;;  %v1723_v22 = vld [vmem:[%s2477_s2 + $0x74] ss:$8 sps:$4 sm:$0xff]  }
  0x62   : > { %v1725_v23 = vld [vmem:[%s2477_s2 + $0x70] ss:$8 sps:$4 sm:$0xff]   ;;  %v1726_v26 = vld [vmem:[%s2146_s25] sm:$0xff]   ;;  %v1740_v28 = vld [vmem:[%s2479_s4 + $0x68] sm:$0xff]   ;;  %p444_p9 = scmp.lt.s32.totalorder %s443_s30, 13  ;;  %s2517_s16 = sld [smem:[#allocation16_spill]] }
  0x63   : > { %v1737_v24 = vld [vmem:[%s2479_s4 + $0x18] sm:$0xff]   ;;  %v1739_v27 = vld [vmem:[%s2479_s4 + $0x20] sm:$0xff]   ;;  %v1728_v30 = vld [vmem:[%s2146_s25 + $0x10] sm:$0xff]   ;;  %s1340_s19 = scalar_lea.sflag [#allocation4], %s2142_s24  ;;  %p2518_p2 = scmp.ne.s32.totalorder %s2505_s29, 0 }
  0x64   : > { %599 = vmatpush1.bf16.msra.mxu0 %v1710_v6  ;;  %1559 = vmatpush3.bf16.msra.mxu1 %v1733_v16  ;;  %v1727_v29 = vld [vmem:[%s2146_s25 + $0x8] sm:$0xff]   ;;  %v1729_v31 = vld [vmem:[%s2146_s25 + $0x18] ss:$0 sps:$4 sm:$0xff]   ;;  %v480_v40 = vld [vmem:[%s2478_s3] sm:$0x3]  ;;  %s2529_s30 = smov (!%p444_p9, %s443_s30), 13 }
  0x65   : > { %600 = vmatprep.subr.bf16.mxu0 %v1711_v7  ;;  %1560 = vmatprep.subr.bf16.mxu1 %v1734_v17  ;;  %v1741_v32 = vld [vmem:[%s2479_s4 + $0x28] sm:$0xff]   ;;  %v1742_v33 = vld [vmem:[%s2479_s4 + $0x70] sm:$0xff]   ;;  %v1744_v35 = vld [vmem:[%s2479_s4 + $0x78] sm:$0xff]   ;;  %v485_v42 = vrot.slane %v480_v40, %v484_v39  ;;  %v489_v43 = vrot.slane %v480_v40, %v488_v41  ;;  %s1489_s12 = sshll.u32 %s2529_s30, 3 }
  0x66   : > { %v1743_v34 = vld [vmem:[%s2479_s4 + $0x30] sm:$0xff]   ;;  %v1745_v36 = vld [vmem:[%s2479_s4 + $0x38] sm:$0xff]   ;;  %s2287_s27 = scalar_lea.vmem %s2486_s11, %s1489_s12  ;;  %s2379_s15 = scalar_lea.vmem %s2476_s1, %s1489_s12 }
  0x68   : > { %601 = vmatpush1.bf16.msra.mxu0 %v1713_v8  ;;  %1561 = vmatpush3.bf16.msra.mxu1 %v1735_v20 }
  0x69   : > { %602 = vmatprep.subr.bf16.mxu0 %v1714_v9  ;;  %1562 = vmatprep.subr.bf16.mxu1 %v1736_v21 }
  0x6c   : > { %603 = vmatpush1.bf16.msra.mxu0 %v1716_v10  ;;  %1563 = vmatpush3.bf16.msra.mxu1 %v1737_v24 }
  0x6d   : > { %604 = vmatprep.subr.bf16.mxu0 %v1717_v11  ;;  %1564 = vmatprep.subr.bf16.mxu1 %v1738_v25 }
  0x70   : > { %605 = vmatpush1.bf16.msra.mxu0 %v1719_v14  ;;  %1565 = vmatpush3.bf16.msra.mxu1 %v1739_v27 }
  0x71   : > { %606 = vmatprep.subr.bf16.mxu0 %v1720_v18  ;;  %1566 = vmatprep.subr.bf16.mxu1 %v1740_v28 }
  0x74   : > { %607 = vmatpush1.bf16.msra.mxu0 %v1722_v19  ;;  %1567 = vmatpush3.bf16.msra.mxu1 %v1741_v32 }
  0x75   : > { %608 = vmatprep.subr.bf16.mxu0 %v1723_v22  ;;  %1568 = vmatprep.subr.bf16.mxu1 %v1742_v33  ;;  %v1746_v33 = vld [vmem:[%s2481_s6] ss:$8 sps:$4 sm:$0xff]  }
  0x78   : > { %609 = vmatpush1.bf16.msra.mxu0 %v1725_v23  ;;  %1569 = vmatpush3.bf16.msra.mxu1 %v1743_v34  ;;  %v1748_v34 = vld [vmem:[%s2481_s6 + $0x4] ss:$8 sps:$4 sm:$0xff]  }
  0x79   : > { %1570 = vmatprep.subr.bf16.mxu1 %v1744_v35  ;;  %1005 = vmatprep.subr.bf16.mxu0 %v1748_v34  ;;  %v1756_v34 = vld [vmem:[%s2483_s8 + $0x18] sm:$0xff]  }
  0x7b   : > { %627 = vmatmul.mubr.bf16.vlgmr.msra.gmra.mrb[0].mxu0 %v1726_v26 }
  0x7c   : > { %636 = vmatprep.mubr.bf16.mxu0 %v1941_v0  ;;  %1571 = vmatpush3.bf16.msra.mxu1 %v1745_v36  ;;  %v1511_v36 = vld [vmem:[#allocation5] ss:$0 sm:$0xff] }
  0x7d   : > { %1006 = vmatpush1.bf16.msra.mxu0 %v1746_v33  ;;  %v1755_v33 = vld [vmem:[%s2483_s8 + $0x58] sm:$0xff]  }
  0x83   : > { %637 = vmatmul.mubr.bf16.gmra.mrb[4].mxu0 %v1727_v29 }
  0x84   : > { %646 = vmatprep.mubr.bf16.mxu0 %v1941_v0 }
  0x8b   : > { %647 = vmatmul.mubr.bf16.gmra.mrb[8].mxu0 %v1728_v30 }
  0x8c   : > { %656 = vmatprep.mubr.bf16.mxu0 %v1941_v0 }
  0x93   : > { %657 = vmatmul.mubr.bf16.gmra.mrb[12].mxu0 %v1729_v31 }
  0x94   : > { %1037 = vmatprep.mubr.bf16.mxu0 %v1941_v0 }
 0x14e   : > { %v628_v44 = vpop.f32.mrb[0].mxu0 }
 0x14f   : > { %v629_v45 = vadd.f32 %v628_v44, %v485_v42  ;;  %v630_v46 = vpop.f32.mrb[1].mxu0 }
 0x150   : > { %v631_v47 = vadd.f32 %v630_v46, %v489_v43  ;;  %v632_v48 = vpop.f32.mrb[2].mxu0 }
 0x151   : > { %v633_v49 = vadd.f32 %v632_v48, %v485_v42  ;;  %v634_v50 = vpop.f32.mrb[3].mxu0  ;;  %v665_v52 = vmax.f32 %v629_v45, 0.0 }
 0x152   : > { %v635_v51 = vadd.f32 %v634_v50, %v489_v43  ;;  %v666_v54 = vmax.f32 %v631_v47, 0.0 }
 0x153   : > { %v667_v53 = vmax.f32 %v633_v49, 0.0 }
 0x154   : > { %v668_v55 = vmax.f32 %v635_v51, 0.0 }
 0x155   : > { %v679_v56 = vpack.c.bf16 %v667_v53, %v665_v52 }
 0x156   : > { %v638_v57 = vpop.f32.mrb[4].mxu0  ;;  %v680_v58 = vpack.c.bf16 %v668_v55, %v666_v54 }
 0x157   : > { %v639_v59 = vadd.f32 %v638_v57, %v485_v42  ;;  %v640_v60 = vpop.f32.mrb[5].mxu0 }
 0x158   : > { %v641_v61 = vadd.f32 %v640_v60, %v489_v43  ;;  %v642_v62 = vpop.f32.mrb[6].mxu0  ;;  %854 = vmatprep.mubr.bf16.mxu1 %v680_v58 }
 0x159   : > { %v643_v63 = vadd.f32 %v642_v62, %v485_v42  ;;  %v644_v1 = vpop.f32.mrb[7].mxu0  ;;  %855 = vmatmul.mubr.bf16.vlgmr.msra.gmra.mrb[0].mxu1 %v679_v56  ;;  %v669_v3 = vmax.f32 %v639_v59, 0.0 }
 0x15a   : > { %v645_v2 = vadd.f32 %v644_v1, %v489_v43  ;;  %v670_v5 = vmax.f32 %v641_v61, 0.0 }
 0x15b   : > { %v671_v4 = vmax.f32 %v643_v63, 0.0 }
 0x15c   : > { %v672_v6 = vmax.f32 %v645_v2, 0.0 }
 0x15d   : > { %v681_v7 = vpack.c.bf16 %v671_v4, %v669_v3 }
 0x15e   : > { %v682_v8 = vpack.c.bf16 %v672_v6, %v670_v5  ;;  %v648_v9 = vpop.f32.mrb[8].mxu0 }
 0x15f   : > { %v649_v10 = vadd.f32 %v648_v9, %v485_v42  ;;  %v650_v11 = vpop.f32.mrb[9].mxu0 }
 0x160   : > { %v651_v12 = vadd.f32 %v650_v11, %v489_v43  ;;  %v652_v13 = vpop.f32.mrb[10].mxu0  ;;  %862 = vmatprep.mubr.bf16.mxu1 %v682_v8 }
 0x161   : > { %v673_v14 = vmax.f32 %v649_v10, 0.0  ;;  %v653_v15 = vadd.f32 %v652_v13, %v485_v42  ;;  %v654_v16 = vpop.f32.mrb[11].mxu0  ;;  %863 = vmatmul.mubr.bf16.gmra.mrb[4].mxu1 %v681_v7 }
 0x162   : > { %v674_v17 = vmax.f32 %v651_v12, 0.0  ;;  %v655_v18 = vadd.f32 %v654_v16, %v489_v43 }
 0x163   : > { %v675_v19 = vmax.f32 %v653_v15, 0.0 }
 0x164   : > { %v676_v20 = vmax.f32 %v655_v18, 0.0 }
 0x165   : > { %v683_v21 = vpack.c.bf16 %v675_v19, %v673_v14 }
 0x166   : > { %v684_v22 = vpack.c.bf16 %v676_v20, %v674_v17  ;;  %v658_v23 = vpop.f32.mrb[12].mxu0 }
 0x167   : > { %v659_v24 = vadd.f32 %v658_v23, %v485_v42  ;;  %v660_v25 = vpop.f32.mrb[13].mxu0 }
 0x168   : > { %870 = vmatprep.mubr.bf16.mxu1 %v684_v22  ;;  %v661_v26 = vadd.f32 %v660_v25, %v489_v43  ;;  %v662_v27 = vpop.f32.mrb[14].mxu0 }
 0x169   : > { %v677_v28 = vmax.f32 %v659_v24, 0.0  ;;  %871 = vmatmul.mubr.bf16.gmra.mrb[8].mxu1 %v683_v21  ;;  %v663_v29 = vpop.f32.mrb[15].mxu0  ;;  %v1750_v27 = vld [vmem:[%s2483_s8] sm:$0xff]  }
 0x16a   : > { %v678_v30 = vmax.f32 %v661_v26, 0.0  ;;  %v1749_v26 = vld [vmem:[%s2483_s8 + $0x40] sm:$0xff]  }
 0x16b   : > { %v685_v32 = vpack.c.bf16 %v677_v28, %v677_v28  ;;  %v1751_v28 = vld [vmem:[%s2483_s8 + $0x48] sm:$0xff]   ;;  %1596 = vmatprep.subr.bf16.mxu1 %v1749_v26 }
 0x16c   : > { %v686_v31 = vpack.c.bf16 %v678_v30, %v678_v30  ;;  %1597 = vmatpush3.bf16.msra.mxu1 %v1750_v27  ;;  %v1752_v30 = vld [vmem:[%s2483_s8 + $0x8] sm:$0xff]  }
 0x16d   : > { %1598 = vmatprep.subr.bf16.mxu1 %v1751_v28 }
 0x16e   : > { %878 = vmatprep.mubr.bf16.mxu1 %v686_v31  ;;  %v1753_v31 = vld [vmem:[%s2483_s8 + $0x50] sm:$0xff]  }
 0x170   : > { %1599 = vmatpush3.bf16.msra.mxu1 %v1752_v30 }
 0x171   : > { %879 = vmatmul.mubr.bf16.gmra.mrb[12].mxu1 %v685_v32  ;;  %v1754_v32 = vld [vmem:[%s2483_s8 + $0x10] sm:$0xff]   ;;  %1600 = vmatprep.subr.bf16.mxu1 %v1753_v31 }
 0x174   : > { %1601 = vmatpush3.bf16.msra.mxu1 %v1754_v32 }
 0x175   : > { %1602 = vmatprep.subr.bf16.mxu1 %v1755_v33 }
 0x178   : > { %1603 = vmatpush3.bf16.msra.mxu1 %v1756_v34 }
 0x22c   : > { %v1572_v35 = vpop.f32.mrb[0].mxu1 }
 0x22d   : > { %v1573_v37 = vpop.f32.mrb[1].mxu1 }
 0x22e   : > { %v1574_v40 = vadd.f32 %v1573_v37, %v1572_v35  ;;  %v1575_v42 = vpop.f32.mrb[2].mxu1  ;;  %v1757_v35 = vld [vmem:[%s2483_s8 + $0x60] sm:$0xff]   ;;  %v1759_v37 = vld [vmem:[%s2483_s8 + $0x68] sm:$0xff]  }
 0x22f   : > { %v1576_v43 = vpop.f32.mrb[3].mxu1  ;;  %1604 = vmatprep.subr.bf16.mxu1 %v1757_v35 }
 0x230   : > { %v2289_v44 = vadd.f32 %v1574_v40, %v1511_v36  ;;  %v1577_v45 = vadd.f32 %v1576_v43, %v1575_v42  ;;  %v1760_v40 = vld [vmem:[%s2483_s8 + $0x28] sm:$0xff]   ;;  %v894_v42 = vld [vmem:[%s2379_s15] sm:$0xff] }
 0x232   : > { %887 = vst.msk [vmem:[%s2287_s27] sm:$0xff] %vm886_vm0, %v2289_v44  ;;  %v901_v46 = vmul.f32 0.5, %v2289_v44  ;;  %v2295_v47 = vadd.f32 %v1577_v45, %v1511_v36  ;;  %v895_v45 = vld [vmem:[%s2379_s15 + $0x8] sm:$0xff] }
 0x234   : > { %v908_v48 = vmul.f32 1.442695, %v901_v46  ;;  %888 = vst.msk [vmem:[%s2287_s27 + $0x8] sm:$0xff] %vm886_vm0, %v2295_v47  ;;  %v902_v49 = vmul.f32 0.5, %v2295_v47  ;;  %v1578_v50 = vpop.f32.mrb[4].mxu1 }
 0x235   : > { %v1579_v51 = vpop.f32.mrb[5].mxu1 }
 0x236   : > { %1765 = vpow2.f32 %v908_v48  ;;  %v910_v52 = vmul.f32 1.442695, %v902_v49  ;;  %v1580_v53 = vadd.f32 %v1579_v51, %v1578_v50  ;;  %v1581_v54 = vpop.f32.mrb[6].mxu1 }
 0x237   : > { %v1582_v55 = vpop.f32.mrb[7].mxu1 }
 0x238   : > { %v2301_v56 = vadd.f32 %v1580_v53, %v1511_v36  ;;  %v1583_v57 = vadd.f32 %v1582_v55, %v1581_v54  ;;  %1767 = vpow2.f32 %v910_v52  ;;  %v896_v52 = vld [vmem:[%s2379_s15 + $0x10] sm:$0xff]  ;;  %v897_v55 = vld [vmem:[%s2379_s15 + $0x18] sm:$0xff] }
 0x23a   : > { %889 = vst.msk [vmem:[%s2287_s27 + $0x10] sm:$0xff] %vm886_vm0, %v2301_v56  ;;  %v903_v58 = vmul.f32 0.5, %v2301_v56  ;;  %v2307_v59 = vadd.f32 %v1583_v57, %v1511_v36 }
 0x23c   : > { %v912_v60 = vmul.f32 1.442695, %v903_v58  ;;  %890 = vst.msk [vmem:[%s2287_s27 + $0x18] sm:$0xff] %vm886_vm0, %v2307_v59  ;;  %v904_v61 = vmul.f32 0.5, %v2307_v59  ;;  %v1584_v62 = vpop.f32.mrb[8].mxu1 }
 0x23d   : > { %v1585_v63 = vpop.f32.mrb[9].mxu1 }
 0x23e   : > { %1769 = vpow2.f32 %v912_v60  ;;  %v914_v1 = vmul.f32 1.442695, %v904_v61  ;;  %v1586_v2 = vadd.f32 %v1585_v63, %v1584_v62  ;;  %v1587_v3 = vpop.f32.mrb[10].mxu1  ;;  %v898_v62 = vld [vmem:[%s2379_s15 + $0x20] sm:$0xff] }
 0x23f   : > { %v1588_v4 = vpop.f32.mrb[11].mxu1 }
 0x240   : > { %v1766_v5 = vpop.eup %1765  ;;  %v2313_v6 = vadd.f32 %v1586_v2, %v1511_v36  ;;  %v1589_v7 = vadd.f32 %v1588_v4, %v1587_v3  ;;  %1771 = vpow2.f32 %v914_v1 }
 0x241   : > { %929 = vrot.lane.b32.xlu0 %v1766_v5, %s1942_s28 }
 0x242   : > { %891 = vst.msk [vmem:[%s2287_s27 + $0x20] sm:$0xff] %vm886_vm0, %v2313_v6  ;;  %v905_v8 = vmul.f32 0.5, %v2313_v6  ;;  %v2320_v9 = vadd.f32 %v1589_v7, %v1511_v36  ;;  %v1768_v10 = vpop.eup %1767  ;;  %v900_v7 = vld [vmem:[%s2379_s15 + $0x30] sm:$0xff] }
 0x244   : > { %v916_v11 = vmul.f32 1.442695, %v905_v8  ;;  %892 = vst.msk [vmem:[%s2287_s27 + $0x28] sm:$0xff] %vm886_vm0, %v2320_v9  ;;  %v906_v12 = vmul.f32 0.5, %v2320_v9  ;;  %v1590_v13 = vpop.f32.mrb[12].mxu1 }
 0x245   : > { %v1591_v14 = vpop.f32.mrb[13].mxu1  ;;  %931 = vrot.lane.b32.xlu0 %v1768_v10, %s1942_s28 }
 0x246   : > { %1773 = vpow2.f32 %v916_v11  ;;  %v918_v15 = vmul.f32 1.442695, %v906_v12  ;;  %v1592_v16 = vadd.f32 %v1591_v14, %v1590_v13  ;;  %v1593_v17 = vpop.f32.mrb[14].mxu1  ;;  %v1761_v13 = vld [vmem:[%s2483_s8 + $0x70] sm:$0xff]   ;;  %v970_v14 = vld [vmem:[%s2482_s7] sm:$0x3] }
 0x247   : > { %v1594_v18 = vpop.f32.mrb[15].mxu1 }
 0x248   : > { %v1770_v19 = vpop.eup %1769  ;;  %1775 = vpow2.f32 %v918_v15  ;;  %v2327_v20 = vadd.f32 %v1592_v16, %v1511_v36  ;;  %v1758_v36 = vld [vmem:[%s2483_s8 + $0x20] sm:$0xff]   ;;  %v975_v15 = vrot.slane %v970_v14, %v484_v39  ;;  %v979_v16 = vrot.slane %v970_v14, %v488_v41 }
 0x249   : > { %933 = vrot.lane.b32.xlu1 %v1770_v19, %s1942_s28  ;;  %1605 = vmatpush3.bf16.msra.mxu1 %v1758_v36 }
 0x24a   : > { %893 = vst.msk [vmem:[%s2287_s27 + $0x30] sm:$0xff] %vm886_vm0, %v2327_v20  ;;  %v907_v21 = vmul.f32 0.5, %v2327_v20  ;;  %v1772_v22 = vpop.eup %1771  ;;  %1606 = vmatprep.subr.bf16.mxu1 %v1759_v37  ;;  %s1638_s27 = smul.u32 56, %s2142_s24 }
 0x24c   : > { %v920_v23 = vmul.f32 1.442695, %v907_v21  ;;  %s434_s25 = scalar_lea.vmem [#allocation7], %s1638_s27 }
 0x24d   : > { %935 = vrot.lane.b32.xlu1 %v1772_v22, %s1942_s28  ;;  %1607 = vmatpush3.bf16.msra.mxu1 %v1760_v40  ;;  %s1358_s30 = sshll.u32 %s434_s25, 4  ;;  %s2431_s30 = int_to_ptr.vmem [resolvable:$true] %s1358_s30 }
 0x24e   : > { %1777 = vpow2.f32 %v920_v23  ;;  %1608 = vmatprep.subr.bf16.mxu1 %v1761_v13  ;;  %s1865_s13 = scalar_lea.vmem %s2431_s30, 896 }
 0x24f   : > { %p1866_p10 = scmp.ne.s32.totalorder %s2431_s30, %s1865_s13 }
 0x250   : > { %v1774_v24 = vpop.eup %1773 }
 0x251   : > { %937 = vrot.lane.b32.xlu0 %v1774_v24, %s1942_s28  ;;  %p1867_p4 = pnand %p1866_p10, %p2518_p2 }
 0x252   : > { %v1776_v25 = vpop.eup %1775 }
 0x253   : > { %939 = vrot.lane.b32.xlu1 %v1776_v25, %s1942_s28  ;;  %p1868_p5 = pneg %p1867_p4 }
 0x258   : > { %v1778_v29 = vpop.eup %1777 }
 0x259   : > { %941 = vrot.lane.b32.xlu0 %v1778_v29, %s1942_s28 }
 0x2b3   : > { %v930_v43 = vpop.permute.xlu0 %929 }
 0x2b4   : > { %v950_v46 = vmul.f32 %v930_v43, %v894_v42 }
 0x2b6   : > { %v957_v50 = vadd.f32 %v950_v46, %v2289_v44 }
 0x2b7   : > { %v932_v48 = vpop.permute.xlu0 %931 }
 0x2b8   : > { %v951_v49 = vmul.f32 %v932_v48, %v895_v45 }
 0x2ba   : > { %v958_v51 = vadd.f32 %v951_v49, %v2295_v47  ;;  %v899_v47 = vld [vmem:[%s2379_s15 + $0x28] sm:$0xff]  ;;  %s1555_s15 = smul.u32 896, %s2027_s21  ;;  %s1943_s21 = smov [#allocation7]  }
 0x2bb   : > { %v934_v53 = vpop.permute.xlu1 %933  ;;  %s1869_s26 = sshll.u32 %s1943_s21, 4  ;;  %s1870_s26 = int_to_ptr.vmem [resolvable:$false] %s1869_s26 }
 0x2bc   : > { %v964_v54 = vpack.c.bf16 %v958_v51, %v957_v50  ;;  %v952_v57 = vmul.f32 %v934_v53, %v896_v52  ;;  %s2429_s17 = scalar_lea.hbm %s2517_s16, %s1555_s15  ;;  %s1871_s14 = scalar_lea.vmem %s1870_s26, 1792 }
 0x2bd   : > { %p1872_p0 = scmp.lt.s32.totalorder %s2431_s30, %s1870_s26  ;;  %p1873_p6 = scmp.lt.s32.totalorder %s1871_s14, %s1865_s13 }
 0x2be   : > { %1530 = vmatmul.mubr.msk.bf16.vlgmr.msra.gmra.mrb[16].mxu0 %vm992_vm1, %v964_v54  ;;  %v959_v61 = vadd.f32 %v952_v57, %v2301_v56 }
 0x2bf   : > { %v936_v58 = vpop.permute.xlu1 %935  ;;  %1047 = vmatprep.mubr.bf16.mxu0 %v1941_v0  ;;  %p1874_p13 = por %p1873_p6, %p1872_p0 }
 0x2c0   : > { %v953_v60 = vmul.f32 %v936_v58, %v897_v55 }
 0x2c1   : > { %p1875_p7 = pnand %p1874_p13, %p1868_p5 }
 0x2c2   : > { %v960_v44 = vadd.f32 %v953_v60, %v2307_v59 }
 0x2c3   : > { %v938_v63 = vpop.permute.xlu0 %937 }
 0x2c4   : > { %v965_v1 = vpack.c.bf16 %v960_v44, %v959_v61  ;;  %v954_v3 = vmul.f32 %v938_v63, %v898_v62 }
 0x2c5   : > { %v940_v2 = vpop.permute.xlu1 %939 }
 0x2c6   : > { %v955_v4 = vmul.f32 %v940_v2, %v899_v47  ;;  %1531 = vmatmul.mubr.msk.bf16.gmra.mrb[20].mxu0 %vm992_vm1, %v965_v1  ;;  %v961_v8 = vadd.f32 %v954_v3, %v2313_v6  ;;  %v1762_v6 = vld [vmem:[%s2483_s8 + $0x30] sm:$0xff]  }
 0x2c7   : > { %1057 = vmatprep.mubr.bf16.mxu0 %v1941_v0  ;;  %1609 = vmatpush3.bf16.msra.mxu1 %v1762_v6 }
 0x2c8   : > { %v962_v5 = vadd.f32 %v955_v4, %v2320_v9  ;;  %v1763_v9 = vld [vmem:[%s2483_s8 + $0x78] sm:$0xff]  }
 0x2c9   : > { %1610 = vmatprep.subr.bf16.mxu1 %v1763_v9 }
 0x2ca   : > { %v966_v56 = vpack.c.bf16 %v962_v5, %v961_v8 }
 0x2cb   : > { %v942_v10 = vpop.permute.xlu0 %941 }
 0x2cc   : > { %v956_v11 = vmul.f32 %v942_v10, %v900_v7 }
 0x2ce   : > { %1532 = vmatmul.mubr.msk.bf16.gmra.mrb[24].mxu0 %vm992_vm1, %v966_v56  ;;  %v963_v59 = vadd.f32 %v956_v11, %v2327_v20  ;;  %v1534_v56 = vld [vmem:[%s2484_s9] ss:$0 sm:$0xff] }
 0x2cf   : > { %1067 = vmatprep.mubr.bf16.mxu0 %v1941_v0  ;;  %v1764_v0 = vld [vmem:[%s2483_s8 + $0x38] sm:$0xff]  }
 0x2d0   : > { %v967_v12 = vpack.c.bf16 %v963_v59, %v963_v59  ;;  %1611 = vmatpush3.bf16.msra.mxu1 %v1764_v0 }
 0x2d6   : > { %1533 = vmatmul.mubr.msk.bf16.gmra.mrb[28].mxu0 %vm992_vm1, %v967_v12 }
 0x391   : > { %v1039_v17 = vpop.f32.mrb[16].mxu0 }
 0x392   : > { %v1040_v18 = vadd.f32 %v1039_v17, %v975_v15  ;;  %v1041_v19 = vpop.f32.mrb[17].mxu0 }
 0x393   : > { %v1042_v20 = vadd.f32 %v1041_v19, %v979_v16  ;;  %v1043_v21 = vpop.f32.mrb[18].mxu0 }
 0x394   : > { %v1044_v22 = vadd.f32 %v1043_v21, %v975_v15  ;;  %v1045_v23 = vpop.f32.mrb[19].mxu0  ;;  %v1076_v25 = vmax.f32 %v1040_v18, 0.0 }
 0x395   : > { %v1046_v24 = vadd.f32 %v1045_v23, %v979_v16  ;;  %v1077_v27 = vmax.f32 %v1042_v20, 0.0 }
 0x396   : > { %v1078_v26 = vmax.f32 %v1044_v22, 0.0 }
 0x397   : > { %v1079_v28 = vmax.f32 %v1046_v24, 0.0 }
 0x398   : > { %v1090_v29 = vpack.c.bf16 %v1078_v26, %v1076_v25 }
 0x399   : > { %v1091_v30 = vpack.c.bf16 %v1079_v28, %v1077_v27  ;;  %v1049_v31 = vpop.f32.mrb[20].mxu0 }
 0x39a   : > { %v1050_v32 = vadd.f32 %v1049_v31, %v975_v15  ;;  %v1051_v39 = vpop.f32.mrb[21].mxu0 }
 0x39b   : > { %v1052_v33 = vadd.f32 %v1051_v39, %v979_v16  ;;  %v1053_v38 = vpop.f32.mrb[22].mxu0  ;;  %1265 = vmatprep.mubr.bf16.mxu1 %v1091_v30 }
 0x39c   : > { %v1054_v41 = vadd.f32 %v1053_v38, %v975_v15  ;;  %v1055_v34 = vpop.f32.mrb[23].mxu0  ;;  %1266 = vmatmul.mubr.bf16.vlgmr.msra.gmra.mrb[16].mxu1 %v1090_v29  ;;  %v1080_v36 = vmax.f32 %v1050_v32, 0.0 }
 0x39d   : > { %v1056_v35 = vadd.f32 %v1055_v34, %v979_v16  ;;  %v1081_v40 = vmax.f32 %v1052_v33, 0.0 }
 0x39e   : > { %v1082_v37 = vmax.f32 %v1054_v41, 0.0 }
 0x39f   : > { %v1083_v42 = vmax.f32 %v1056_v35, 0.0 }
 0x3a0   : > { %v1092_v43 = vpack.c.bf16 %v1082_v37, %v1080_v36 }
 0x3a1   : > { %v1093_v45 = vpack.c.bf16 %v1083_v42, %v1081_v40  ;;  %v1059_v46 = vpop.f32.mrb[24].mxu0 }
 0x3a2   : > { %v1060_v48 = vadd.f32 %v1059_v46, %v975_v15  ;;  %v1061_v49 = vpop.f32.mrb[25].mxu0 }
 0x3a3   : > { %v1062_v50 = vadd.f32 %v1061_v49, %v979_v16  ;;  %v1063_v51 = vpop.f32.mrb[26].mxu0  ;;  %1273 = vmatprep.mubr.bf16.mxu1 %v1093_v45 }
 0x3a4   : > { %v1064_v52 = vadd.f32 %v1063_v51, %v975_v15  ;;  %v1065_v53 = vpop.f32.mrb[27].mxu0  ;;  %1274 = vmatmul.mubr.bf16.gmra.mrb[20].mxu1 %v1092_v43  ;;  %v1084_v55 = vmax.f32 %v1060_v48, 0.0 }
 0x3a5   : > { %v1066_v54 = vadd.f32 %v1065_v53, %v979_v16  ;;  %v1085_v58 = vmax.f32 %v1062_v50, 0.0 }
 0x3a6   : > { %v1086_v57 = vmax.f32 %v1064_v52, 0.0 }
 0x3a7   : > { %v1087_v60 = vmax.f32 %v1066_v54, 0.0 }
 0x3a8   : > { %v1094_v61 = vpack.c.bf16 %v1086_v57, %v1084_v55 }
 0x3a9   : > { %v1095_v44 = vpack.c.bf16 %v1087_v60, %v1085_v58  ;;  %v1069_v62 = vpop.f32.mrb[28].mxu0 }
 0x3aa   : > { %v1070_v63 = vadd.f32 %v1069_v62, %v975_v15  ;;  %v1071_v47 = vpop.f32.mrb[29].mxu0 }
 0x3ab   : > { %v1072_v1 = vadd.f32 %v1071_v47, %v979_v16  ;;  %v1073_v2 = vpop.f32.mrb[30].mxu0  ;;  %1281 = vmatprep.mubr.bf16.mxu1 %v1095_v44 }
 0x3ac   : > { %v1074_v3 = vpop.f32.mrb[31].mxu0  ;;  %1282 = vmatmul.mubr.bf16.gmra.mrb[24].mxu1 %v1094_v61  ;;  %v1088_v5 = vmax.f32 %v1070_v63, 0.0 }
 0x3ad   : > { %v1089_v4 = vmax.f32 %v1072_v1, 0.0 }
 0x3ae   : > { %v1096_v8 = vpack.c.bf16 %v1088_v5, %v1088_v5 }
 0x3af   : > { %v1097_v7 = vpack.c.bf16 %v1089_v4, %v1089_v4 }
 0x3b1   : > { %1289 = vmatprep.mubr.bf16.mxu1 %v1097_v7 }
 0x3b4   : > { %1290 = vmatmul.mubr.bf16.gmra.mrb[28].mxu1 %v1096_v8 }
 0x46f   : > { %v1612_v10 = vpop.f32.mrb[16].mxu1 }
 0x470   : > { %v1613_v11 = vpop.f32.mrb[17].mxu1 }
 0x471   : > { %v1614_v59 = vadd.f32 %v1613_v11, %v1612_v10  ;;  %v1615_v12 = vpop.f32.mrb[18].mxu1 }
 0x472   : > { %v1616_v13 = vpop.f32.mrb[19].mxu1 }
 0x473   : > { %v1268_v6 = vadd.f32 %v1614_v59, %v1534_v56  ;;  %v1617_v9 = vadd.f32 %v1616_v13, %v1615_v12 }
 0x475   : > { %v1297_v0 = vsub.f32 0.0, %v1268_v6  ;;  %v1271_v14 = vadd.f32 %v1617_v9, %v1534_v56 }
 0x477   : > { %v1304_v15 = vmul.f32 1.442695, %v1297_v0  ;;  %v1298_v16 = vsub.f32 0.0, %v1271_v14  ;;  %v1618_v17 = vpop.f32.mrb[20].mxu1 }
 0x478   : > { %v1619_v18 = vpop.f32.mrb[21].mxu1 }
 0x479   : > { %1779 = vpow2.f32 %v1304_v15  ;;  %v1306_v19 = vmul.f32 1.442695, %v1298_v16  ;;  %v1620_v20 = vadd.f32 %v1619_v18, %v1618_v17  ;;  %v1621_v21 = vpop.f32.mrb[22].mxu1 }
 0x47a   : > { %v1622_v22 = vpop.f32.mrb[23].mxu1 }
 0x47b   : > { %1781 = vpow2.f32 %v1306_v19  ;;  %v1276_v23 = vadd.f32 %v1620_v20, %v1534_v56  ;;  %v1623_v24 = vadd.f32 %v1622_v22, %v1621_v21 }
 0x47d   : > { %v1299_v25 = vsub.f32 0.0, %v1276_v23  ;;  %v1279_v26 = vadd.f32 %v1623_v24, %v1534_v56 }
 0x47f   : > { %v1308_v27 = vmul.f32 1.442695, %v1299_v25  ;;  %v1300_v28 = vsub.f32 0.0, %v1279_v26  ;;  %v1624_v29 = vpop.f32.mrb[24].mxu1 }
 0x480   : > { %v1625_v30 = vpop.f32.mrb[25].mxu1 }
 0x481   : > { %1783 = vpow2.f32 %v1308_v27  ;;  %v1310_v31 = vmul.f32 1.442695, %v1300_v28  ;;  %v1626_v32 = vadd.f32 %v1625_v30, %v1624_v29  ;;  %v1627_v39 = vpop.f32.mrb[26].mxu1 }
 0x482   : > { %v1628_v33 = vpop.f32.mrb[27].mxu1 }
 0x483   : > { %v1780_v38 = vpop.eup %1779  ;;  %1785 = vpow2.f32 %v1310_v31  ;;  %v1284_v41 = vadd.f32 %v1626_v32, %v1534_v56  ;;  %v1629_v34 = vadd.f32 %v1628_v33, %v1627_v39 }
 0x484   : > { %v1318_v35 = vadd.f32 1.0, %v1780_v38 }
 0x485   : > { %v1782_v36 = vpop.eup %1781  ;;  %v1301_v37 = vsub.f32 0.0, %v1284_v41  ;;  %v1287_v40 = vadd.f32 %v1629_v34, %v1534_v56 }
 0x486   : > { %1787 = vrcp.f32 %v1318_v35  ;;  %v1319_v42 = vadd.f32 1.0, %v1782_v36 }
 0x487   : > { %v1312_v43 = vmul.f32 1.442695, %v1301_v37  ;;  %v1302_v45 = vsub.f32 0.0, %v1287_v40  ;;  %v1630_v46 = vpop.f32.mrb[28].mxu1 }
 0x488   : > { %1789 = vrcp.f32 %v1319_v42  ;;  %v1631_v48 = vpop.f32.mrb[29].mxu1 }
 0x489   : > { %1791 = vpow2.f32 %v1312_v43  ;;  %v1314_v49 = vmul.f32 1.442695, %v1302_v45  ;;  %v1632_v50 = vadd.f32 %v1631_v48, %v1630_v46  ;;  %v1633_v51 = vpop.f32.mrb[30].mxu1 }
 0x48a   : > { %v1634_v52 = vpop.f32.mrb[31].mxu1 }
 0x48b   : > { %v1784_v53 = vpop.eup %1783  ;;  %1793 = vpow2.f32 %v1314_v49  ;;  %v1292_v54 = vadd.f32 %v1632_v50, %v1534_v56 }
 0x48c   : > { %v1320_v55 = vadd.f32 1.0, %v1784_v53 }
 0x48d   : > { %v1786_v57 = vpop.eup %1785  ;;  %v1303_v58 = vsub.f32 0.0, %v1292_v54 }
 0x48e   : > { %1795 = vrcp.f32 %v1320_v55  ;;  %v1321_v60 = vadd.f32 1.0, %v1786_v57 }
 0x48f   : > { %v1316_v61 = vmul.f32 1.442695, %v1303_v58 }
 0x490   : > { %v1788_v44 = vpop.eup %1787  ;;  %1797 = vrcp.f32 %v1321_v60 }
 0x491   : > { %1332 = vst [vmem:[%s434_s25] sm:$0xff] %v1788_v44  ;;  %1799 = vpow2.f32 %v1316_v61 }
 0x492   : > { %v1790_v62 = vpop.eup %1789 }
 0x493   : > { %v1792_v63 = vpop.eup %1791  ;;  %1333 = vst [vmem:[%s434_s25 + $0x8] sm:$0xff] %v1790_v62 }
 0x494   : > { %v1322_v47 = vadd.f32 1.0, %v1792_v63 }
 0x495   : > { %v1794_v1 = vpop.eup %1793 }
 0x496   : > { %1801 = vrcp.f32 %v1322_v47  ;;  %v1323_v2 = vadd.f32 1.0, %v1794_v1 }
 0x498   : > { %v1796_v3 = vpop.eup %1795  ;;  %1803 = vrcp.f32 %v1323_v2 }
 0x499   : > { %1334 = vst [vmem:[%s434_s25 + $0x10] sm:$0xff] %v1796_v3 }
 0x49a   : > { %v1798_v4 = vpop.eup %1797 }
 0x49b   : > { %v1800_v5 = vpop.eup %1799  ;;  %1335 = vst [vmem:[%s434_s25 + $0x18] sm:$0xff] %v1798_v4 }
 0x49c   : > { %v1324_v7 = vadd.f32 1.0, %v1800_v5 }
 0x49e   : > { %1805 = vrcp.f32 %v1324_v7 }
 0x4a0   : > { %v1802_v8 = vpop.eup %1801 }
 0x4a1   : > { %1336 = vst [vmem:[%s434_s25 + $0x20] sm:$0xff] %v1802_v8 }
 0x4a2   : > { %v1804_v10 = vpop.eup %1803 }
 0x4a3   : > { %1337 = vst [vmem:[%s434_s25 + $0x28] sm:$0xff] %v1804_v10 }
 0x4a8   : > { %v1806_v56 = vpop.eup %1805 }
 0x4a9   : > { %1338 = vst [vmem:[%s434_s25 + $0x30] sm:$0xff] %v1806_v56 }
 0x4aa   : > { %1878 = shalt.err (!%p1875_p7)
}
 0x4ab   : > { %s1879_s10 = scalar_lea.hbm %s2429_s17, 896  ;;  %s1883_s27 = scalar_lea.hbm %s2517_s16, 1792 }
 0x4ac   : > { %p1880_p3 = scmp.ne.s32.totalorder %s2429_s17, %s1879_s10  ;;  %p1884_p11 = scmp.lt.u32.totalorder %s2429_s17, %s2517_s16 }
 0x4ad   : > { %p1885_p8 = scmp.lt.u32.totalorder %s1883_s27, %s1879_s10  ;;  %p1887_p10 = scmp.lt.u32.totalorder %s1879_s10, %s2429_s17 }
 0x4ae   : > { %p1881_p12 = pnand %p1880_p3, %p2518_p2 }
 0x4af   : > { %p1886_p9 = por %p1885_p8, %p1884_p11 }
 0x4b0   : > { %p1882_p1 = pneg %p1881_p12 }
 0x4b1   : > { %p1888_p4 = por %p1887_p10, %p1886_p9 }
 0x4b3   : > { %p1889_p5 = pnand %p1888_p4, %p1882_p1 }
 0x4b5   : > { %1892 = shalt.err (!%p1889_p5)
}
 0x4b6   : > { %s1944_s12 = smov 128   ;;  %s1945_s28 = smov 8  }
 0x4b7   : > { %1645 = dma.vmem_to_hbm [thread:$0]  (%p2518_p2), %s2431_s30, 896, %s2429_s17, %s1340_s19, %s1944_s12, %s1944_s12, %s1945_s28  }
 0x4b8 PF: > { %s2519_s13 = sld [smem:[#allocation11_spill]]  ;;  %s2520_s21 = sld [smem:[#allocation15_spill]] }
 0x4b9   : > { %p2522_p6 = scmp.ge.s32.totalorder %s1935_s20, 2 }
 0x4be   : > { %s1377_s26 = sand.u32 1, %s2519_s13   ;;  %p2521_p0 = scmp.ne.s32.totalorder %s2520_s21, 0 }
 0x4bf   : > { %s1378_s14 = scalar_lea.sflag [#allocation4], %s1377_s26 }
 0x4c0   : > { %p1656_p13 = pnand %p2522_p6, %p2521_p0 }
 0x4c2   : > { %1918 = dma.done.wait (!%p1656_p13), %s1378_s14, 896  }
 0x4c3   : > { %1920 = vsyncadd (!%p1656_p13), %s1378_s14, 4294966400  ;;  %s2523_s20 = sld [smem:[#allocation13_spill]]  ;;  %s2524_s10 = sld [smem:[#allocation12_spill]] }
 0x4c4   : > { %s2525_s19 = sld [smem:[#allocation14_spill]]  ;;  %s2526_s17 = smov %s1927_s18 }
 0x4c9   : > { %p26_p7 = scmp.ge.s32.totalorder %s2523_s20, 4   ;;  %s2527_s18 = smov %s2524_s10 }
 0x4cb   :  { %28 = sbr.rel (!%p26_p7) target bundleno = 8 (0x8), region = 124 }
 0x4d2   :  { %1391 = vsyncpa [#allocation3], 1 }
 0x4d3   :  { %1393 = vsyncpa [#allocation3 + $0x1], 1 }
 0x4d4   :  { %1394 = vsyncpa [#allocation6], 1 }
 0x4d5   :  { %1395 = vsyncpa [#allocation4], 1 }
 0x4d6   :  { %1397 = vsyncpa [#allocation4 + $0x1], 1 }

</bundles_post_ra>
